<compile_context>
chip_gen: v7x
topology: tpu7x:2x2x1
jax: 0.10.0
libtpu: 0.0.40
codegen_flags: <defaults>
</compile_context>

<pallas_src>
import jax
import jax.numpy as jnp
from jax import lax
from jax.experimental import pallas as pl
from jax.experimental.pallas import tpu as pltpu

HIDDEN = 32
INPUT_SIZE = 1
OUT_SIZE = 1
MAX_CHUNK = 256   # seq timesteps resident in VMEM per grid step
UNROLL = 8        # capped unroll of the serial recurrence loop


def rnn_kernel(x_ref, h0_ref, wh_ref, p_ref, outs_ref, hN_ref,
               xw_ref, proj_ref):
    chunk = x_ref.shape[0]
    batch = x_ref.shape[1]

    # hN output block is grid-resident (same block index every chunk) and
    # doubles as the cross-chunk hidden-state carry.
    @pl.when(pl.program_id(0) == 0)
    def _():
        hN_ref[...] = h0_ref[...]

    pv = p_ref[...]                       # (4, H) packed small params
    wx3 = pv[0][None, None, :]            # (1, 1, H)  W_ih^T (input_size == 1)
    b3 = pv[1][None, None, :]             # (1, 1, H)  b_ih + b_hh
    wo = pv[2][None, :]                   # (1, H)     Linear(32, 1) weight
    bo = pv[3:4, 0:1]                     # (1, 1)     Linear(32, 1) bias

    # Hoisted input projection for the whole chunk: one broadcast VPU op
    # (INPUT_SIZE == 1), so only the HxH matmul + tanh sit on the serial path.
    xw_ref[...] = x_ref[...] * wx3 + b3   # (chunk, batch, H)

    wh = wh_ref[...]                      # (H, H), kept in vregs

    def step(t, h):
        # Serial critical path: 32x32 MXU matmul + EUP tanh.  The projection
        # (VPU mul + XLU lane-reduce) and the tiny VMEM store are free filler.
        h_new = jnp.tanh(
            xw_ref[t] + jnp.dot(h, wh, preferred_element_type=jnp.float32))
        proj = jnp.sum(h_new * wo, axis=-1)            # (batch,)
        proj_ref[pl.ds(t, 1), :] = proj.reshape(1, batch)
        return h_new

    h_last = lax.fori_loop(0, chunk, step, hN_ref[...],
                           unroll=min(UNROLL, chunk))
    hN_ref[...] = h_last

    # Lane-dense output block: (batch, chunk) with seq on the lane axis.
    outs_ref[...] = jnp.transpose(proj_ref[...]) + bo


def _pick_chunk(seq):
    if seq <= MAX_CHUNK:
        return seq
    for c in (256, 128):
        if seq % c == 0:
            return c
    # TODO(synk): pad + mask ragged sequence lengths instead of falling back
    # to whole-sequence residency.
    return seq


def rnn_forward(x, h0, params):
    """x: (batch, seq, 1) batch-first like PyTorch. h0: None or (1, batch, 32)."""
    batch, seq, _ = x.shape
    x_tm = jnp.transpose(x, (1, 0, 2))                     # (seq, batch, 1)

    wh = params["w_hh"].T                                  # (H, H)
    pvec = jnp.stack([
        params["w_ih"][:, 0],                              # W_ih^T row
        params["b_ih"] + params["b_hh"],                   # fused RNN bias
        params["w_out"][0],                                # Linear weight row
        jnp.full((HIDDEN,), params["b_out"][0], jnp.float32),  # Linear bias
    ], axis=0).astype(jnp.float32)                         # (4, H)

    if h0 is None:
        h0 = jnp.zeros((1, batch, HIDDEN), jnp.float32)
    h0_2d = h0[0]                                          # (batch, H)

    chunk = _pick_chunk(seq)
    num_chunks = seq // chunk

    outs_bs, hN = pl.pallas_call(
        rnn_kernel,
        out_shape=(
            jax.ShapeDtypeStruct((batch, seq), jnp.float32),
            jax.ShapeDtypeStruct((batch, HIDDEN), jnp.float32),
        ),
        grid_spec=pltpu.PrefetchScalarGridSpec(
            num_scalar_prefetch=0,
            grid=(num_chunks,),
            in_specs=[
                pl.BlockSpec((chunk, batch, INPUT_SIZE),
                             lambda c: (c, 0, 0)),                  # x chunk
                pl.BlockSpec((batch, HIDDEN), lambda c: (0, 0)),    # h0
                pl.BlockSpec((HIDDEN, HIDDEN), lambda c: (0, 0)),   # W_hh^T
                pl.BlockSpec((4, HIDDEN), lambda c: (0, 0)),        # packed params
            ],
            out_specs=[
                pl.BlockSpec((batch, chunk), lambda c: (0, c)),     # outs (lane-dense)
                pl.BlockSpec((batch, HIDDEN), lambda c: (0, 0)),    # final h (resident carry)
            ],
            scratch_shapes=[
                pltpu.VMEM((chunk, batch, HIDDEN), jnp.float32),    # xw (input proj)
                pltpu.VMEM((chunk, batch), jnp.float32),            # per-step projections
            ],
        ),
        compiler_params=pltpu.CompilerParams(
            dimension_semantics=("arbitrary",)),
    )(x_tm, h0_2d, wh, pvec)

    # PyTorch semantics: r_out (batch, seq, 32).reshape(-1, 32) -> Linear,
    # i.e. rows in batch-major order — exactly (batch, seq).reshape(-1, 1).
    outs = outs_bs.reshape(batch * seq, OUT_SIZE)
    h_state = hN[None]                                     # (1, batch, H)
    return outs, h_state


def ref_forward(x, h0, params):
    """Pure-JAX reference matching torch.nn.RNN(tanh) + Linear."""
    batch, seq, _ = x.shape
    h = jnp.zeros((batch, HIDDEN), jnp.float32) if h0 is None else h0[0]

    def step(h, xt):
        h_new = jnp.tanh(xt @ params["w_ih"].T + params["b_ih"]
                         + h @ params["w_hh"].T + params["b_hh"])
        return h_new, h_new

    hN, r = jax.lax.scan(step, h, jnp.transpose(x, (1, 0, 2)))
    r_bf = jnp.transpose(r, (1, 0, 2)).reshape(-1, HIDDEN)
    o = r_bf @ params["w_out"].T + params["b_out"]
    return o, hN[None]


if __name__ == "__main__":
    key = jax.random.PRNGKey(0)
    kx, k1, k2, k3, k4, k5, k6 = jax.random.split(key, 7)
    bound = 1.0 / float(jnp.sqrt(HIDDEN))
    params = {
        "w_ih": jax.random.uniform(k1, (HIDDEN, INPUT_SIZE), jnp.float32, -bound, bound),
        "w_hh": jax.random.uniform(k2, (HIDDEN, HIDDEN), jnp.float32, -bound, bound),
        "b_ih": jax.random.uniform(k3, (HIDDEN,), jnp.float32, -bound, bound),
        "b_hh": jax.random.uniform(k4, (HIDDEN,), jnp.float32, -bound, bound),
        "w_out": jax.random.uniform(k5, (OUT_SIZE, HIDDEN), jnp.float32, -bound, bound),
        "b_out": jax.random.uniform(k6, (OUT_SIZE,), jnp.float32, -bound, bound),
    }

    batch, seq = 2, 8
    x = jax.random.normal(kx, (batch, seq, INPUT_SIZE), jnp.float32)
    h0 = None  # mirrors the script-level `h_state = None`

    outs, h_state = rnn_forward(x, h0, params)
    jax.block_until_ready((outs, h_state))

    ref_outs, ref_h = ref_forward(x, h0, params)
    assert outs.shape == (batch * seq, OUT_SIZE)
    assert h_state.shape == (1, batch, HIDDEN)
    assert jnp.allclose(outs, ref_outs, atol=1e-5, rtol=1e-5)
    assert jnp.allclose(h_state, ref_h, atol=1e-5, rtol=1e-5)

    print("KERNEL_OK")
</pallas_src>

<mosaic_0001>
module attributes {stable_mosaic.version = 11 : i64} {
  func.func @rnn_kernel(%arg0: i32, %arg1: memref<8x2x1xf32, #tpu.memory_space<vmem>>, %arg2: memref<2x32xf32, #tpu.memory_space<vmem>>, %arg3: memref<32x32xf32, #tpu.memory_space<vmem>>, %arg4: memref<4x32xf32, #tpu.memory_space<vmem>>, %arg5: memref<2x8xf32, #tpu.memory_space<vmem>>, %arg6: memref<2x32xf32, #tpu.memory_space<vmem>>, %arg7: memref<8x2x32xf32, #tpu.memory_space<vmem>>, %arg8: memref<8x2xf32, #tpu.memory_space<vmem>>) attributes {dimension_semantics = [#tpu.dimension_semantics<arbitrary>], iteration_bounds = array<i64: 1>, scalar_prefetch = 0 : i64, scratch_operands = 2 : i64, tpu.core_type = #tpu.core_type<tc>, window_params = [{transform_indices = @transform_0, window_bounds = array<i64: 8, 2, 1>}, {pipeline_mode = #tpu.pipeline_mode<synchronous>, transform_indices = @transform_1, window_bounds = array<i64: 2, 32>}, {pipeline_mode = #tpu.pipeline_mode<synchronous>, transform_indices = @transform_2, window_bounds = array<i64: 32, 32>}, {pipeline_mode = #tpu.pipeline_mode<synchronous>, transform_indices = @transform_3, window_bounds = array<i64: 4, 32>}, {transform_indices = @transform_4, window_bounds = array<i64: 2, 8>}, {pipeline_mode = #tpu.pipeline_mode<synchronous>, transform_indices = @transform_5, window_bounds = array<i64: 2, 32>}]} {
    %c0_i32 = arith.constant 0 : i32
    %0 = arith.cmpi eq, %arg0, %c0_i32 : i32
    %1 = arith.extui %0 : i1 to i32
    %c0_i32_0 = arith.constant 0 : i32
    %2 = arith.cmpi ne, %1, %c0_i32_0 : i32
    scf.if %2 {
      %c0_58 = arith.constant 0 : index
      %c0_59 = arith.constant 0 : index
      %125 = vector.load %arg2[%c0_58, %c0_59] : memref<2x32xf32, #tpu.memory_space<vmem>>, vector<2x32xf32>
      %c0_60 = arith.constant 0 : index
      %c0_61 = arith.constant 0 : index
      %126 = vector.load %arg6[%c0_60, %c0_61] : memref<2x32xf32, #tpu.memory_space<vmem>>, vector<2x32xf32>
      tpu.vector_store %arg6[%c0_60, %c0_61], %125 {strides = array<i32>} : memref<2x32xf32, #tpu.memory_space<vmem>>, vector<2x32xf32>,
    } else {
    }
    %c0 = arith.constant 0 : index
    %c0_1 = arith.constant 0 : index
    %3 = vector.load %arg4[%c0, %c0_1] : memref<4x32xf32, #tpu.memory_space<vmem>>, vector<4x32xf32>
    %4 = vector.extract_strided_slice %3 {offsets = [0, 0], sizes = [1, 32], strides = [1, 1]} : vector<4x32xf32> to vector<1x32xf32>
    %5 = vector.shape_cast %4 : vector<1x32xf32> to vector<32xf32>
    %6 = vector.shape_cast %5 : vector<32xf32> to vector<1x1x32xf32>
    %7 = vector.extract_strided_slice %3 {offsets = [1, 0], sizes = [1, 32], strides = [1, 1]} : vector<4x32xf32> to vector<1x32xf32>
    %8 = vector.shape_cast %7 : vector<1x32xf32> to vector<32xf32>
    %9 = vector.shape_cast %8 : vector<32xf32> to vector<1x1x32xf32>
    %10 = vector.extract_strided_slice %3 {offsets = [2, 0], sizes = [1, 32], strides = [1, 1]} : vector<4x32xf32> to vector<1x32xf32>
    %11 = vector.shape_cast %10 : vector<1x32xf32> to vector<32xf32>
    %12 = vector.shape_cast %11 : vector<32xf32> to vector<1x32xf32>
    %13 = vector.extract_strided_slice %3 {offsets = [3, 0], sizes = [1, 1], strides = [1, 1]} : vector<4x32xf32> to vector<1x1xf32>
    %c0_2 = arith.constant 0 : index
    %c0_3 = arith.constant 0 : index
    %c0_4 = arith.constant 0 : index
    %14 = vector.load %arg1[%c0_2, %c0_3, %c0_4] : memref<8x2x1xf32, #tpu.memory_space<vmem>>, vector<8x2x1xf32>
    %15 = vector.broadcast %14 : vector<8x2x1xf32> to vector<8x2x32xf32>
    %16 = vector.broadcast %6 : vector<1x1x32xf32> to vector<8x2x32xf32>
    %17 = arith.mulf %15, %16 : vector<8x2x32xf32>
    %18 = vector.broadcast %9 : vector<1x1x32xf32> to vector<8x2x32xf32>
    %19 = arith.addf %17, %18 : vector<8x2x32xf32>
    %c0_5 = arith.constant 0 : index
    %c0_6 = arith.constant 0 : index
    %c0_7 = arith.constant 0 : index
    %20 = vector.load %arg7[%c0_5, %c0_6, %c0_7] : memref<8x2x32xf32, #tpu.memory_space<vmem>>, vector<8x2x32xf32>
    tpu.vector_store %arg7[%c0_5, %c0_6, %c0_7], %19 {strides = array<i32>} : memref<8x2x32xf32, #tpu.memory_space<vmem>>, vector<8x2x32xf32>,
    %c0_8 = arith.constant 0 : index
    %c0_9 = arith.constant 0 : index
    %21 = vector.load %arg3[%c0_8, %c0_9] : memref<32x32xf32, #tpu.memory_space<vmem>>, vector<32x32xf32>
    %c0_10 = arith.constant 0 : index
    %c0_11 = arith.constant 0 : index
    %22 = vector.load %arg6[%c0_10, %c0_11] : memref<2x32xf32, #tpu.memory_space<vmem>>, vector<2x32xf32>
    %c0_i32_12 = arith.constant 0 : i32
    %23 = arith.index_cast %c0_i32_12 : i32 to index
    %c0_13 = arith.constant 0 : index
    %c0_14 = arith.constant 0 : index
    %24 = vector.load %arg7[%23, %c0_13, %c0_14] : memref<8x2x32xf32, #tpu.memory_space<vmem>>, vector<1x2x32xf32>
    %25 = vector.shape_cast %24 : vector<1x2x32xf32> to vector<2x32xf32>
    %cst = arith.constant dense<0.000000e+00> : vector<2x32xf32>
    %26 = tpu.matmul %22, %21, %cst {dimension_numbers = #tpu.dot_dimension_numbers<[1], [0], [0], [1], [0, 0, 1, 1], [], []>} : vector<2x32xf32>, vector<32x32xf32>, vector<2x32xf32> -> vector<2x32xf32>
    %27 = arith.addf %25, %26 : vector<2x32xf32>
    %28 = math.tanh %27 : vector<2x32xf32>
    %29 = vector.broadcast %12 : vector<1x32xf32> to vector<2x32xf32>
    %30 = arith.mulf %28, %29 : vector<2x32xf32>
    %cst_15 = arith.constant dense<0.000000e+00> : vector<2xf32>
    %31 = vector.multi_reduction <add>, %30, %cst_15 [1] : vector<2x32xf32> to vector<2xf32>
    %32 = vector.shape_cast %31 : vector<2xf32> to vector<1x2xf32>
    %33 = arith.index_cast %c0_i32_12 : i32 to index
    %c0_16 = arith.constant 0 : index
    %34 = vector.load %arg8[%33, %c0_16] : memref<8x2xf32, #tpu.memory_space<vmem>>, vector<1x2xf32>
    tpu.vector_store %arg8[%33, %c0_16], %32 {strides = array<i32>} : memref<8x2xf32, #tpu.memory_space<vmem>>, vector<1x2xf32>,
    %c1_i32 = arith.constant 1 : i32
    %35 = arith.index_cast %c1_i32 : i32 to index
    %c0_17 = arith.constant 0 : index
    %c0_18 = arith.constant 0 : index
    %36 = vector.load %arg7[%35, %c0_17, %c0_18] : memref<8x2x32xf32, #tpu.memory_space<vmem>>, vector<1x2x32xf32>
    %37 = vector.shape_cast %36 : vector<1x2x32xf32> to vector<2x32xf32>
    %cst_19 = arith.constant dense<0.000000e+00> : vector<2x32xf32>
    %38 = tpu.matmul %28, %21, %cst_19 {dimension_numbers = #tpu.dot_dimension_numbers<[1], [0], [0], [1], [0, 0, 1, 1], [], []>} : vector<2x32xf32>, vector<32x32xf32>, vector<2x32xf32> -> vector<2x32xf32>
    %39 = arith.addf %37, %38 : vector<2x32xf32>
    %40 = math.tanh %39 : vector<2x32xf32>
    %41 = vector.broadcast %12 : vector<1x32xf32> to vector<2x32xf32>
    %42 = arith.mulf %40, %41 : vector<2x32xf32>
    %cst_20 = arith.constant dense<0.000000e+00> : vector<2xf32>
    %43 = vector.multi_reduction <add>, %42, %cst_20 [1] : vector<2x32xf32> to vector<2xf32>
    %44 = vector.shape_cast %43 : vector<2xf32> to vector<1x2xf32>
    %45 = arith.index_cast %c1_i32 : i32 to index
    %c0_21 = arith.constant 0 : index
    %46 = vector.load %arg8[%45, %c0_21] : memref<8x2xf32, #tpu.memory_space<vmem>>, vector<1x2xf32>
    tpu.vector_store %arg8[%45, %c0_21], %44 {strides = array<i32>} : memref<8x2xf32, #tpu.memory_space<vmem>>, vector<1x2xf32>,
    %c2_i32 = arith.constant 2 : i32
    %47 = arith.index_cast %c2_i32 : i32 to index
    %c0_22 = arith.constant 0 : index
    %c0_23 = arith.constant 0 : index
    %48 = vector.load %arg7[%47, %c0_22, %c0_23] : memref<8x2x32xf32, #tpu.memory_space<vmem>>, vector<1x2x32xf32>
    %49 = vector.shape_cast %48 : vector<1x2x32xf32> to vector<2x32xf32>
    %cst_24 = arith.constant dense<0.000000e+00> : vector<2x32xf32>
    %50 = tpu.matmul %40, %21, %cst_24 {dimension_numbers = #tpu.dot_dimension_numbers<[1], [0], [0], [1], [0, 0, 1, 1], [], []>} : vector<2x32xf32>, vector<32x32xf32>, vector<2x32xf32> -> vector<2x32xf32>
    %51 = arith.addf %49, %50 : vector<2x32xf32>
    %52 = math.tanh %51 : vector<2x32xf32>
    %53 = vector.broadcast %12 : vector<1x32xf32> to vector<2x32xf32>
    %54 = arith.mulf %52, %53 : vector<2x32xf32>
    %cst_25 = arith.constant dense<0.000000e+00> : vector<2xf32>
    %55 = vector.multi_reduction <add>, %54, %cst_25 [1] : vector<2x32xf32> to vector<2xf32>
    %56 = vector.shape_cast %55 : vector<2xf32> to vector<1x2xf32>
    %57 = arith.index_cast %c2_i32 : i32 to index
    %c0_26 = arith.constant 0 : index
    %58 = vector.load %arg8[%57, %c0_26] : memref<8x2xf32, #tpu.memory_space<vmem>>, vector<1x2xf32>
    tpu.vector_store %arg8[%57, %c0_26], %56 {strides = array<i32>} : memref<8x2xf32, #tpu.memory_space<vmem>>, vector<1x2xf32>,
    %c3_i32 = arith.constant 3 : i32
    %59 = arith.index_cast %c3_i32 : i32 to index
    %c0_27 = arith.constant 0 : index
    %c0_28 = arith.constant 0 : index
    %60 = vector.load %arg7[%59, %c0_27, %c0_28] : memref<8x2x32xf32, #tpu.memory_space<vmem>>, vector<1x2x32xf32>
    %61 = vector.shape_cast %60 : vector<1x2x32xf32> to vector<2x32xf32>
    %cst_29 = arith.constant dense<0.000000e+00> : vector<2x32xf32>
    %62 = tpu.matmul %52, %21, %cst_29 {dimension_numbers = #tpu.dot_dimension_numbers<[1], [0], [0], [1], [0, 0, 1, 1], [], []>} : vector<2x32xf32>, vector<32x32xf32>, vector<2x32xf32> -> vector<2x32xf32>
    %63 = arith.addf %61, %62 : vector<2x32xf32>
    %64 = math.tanh %63 : vector<2x32xf32>
    %65 = vector.broadcast %12 : vector<1x32xf32> to vector<2x32xf32>
    %66 = arith.mulf %64, %65 : vector<2x32xf32>
    %cst_30 = arith.constant dense<0.000000e+00> : vector<2xf32>
    %67 = vector.multi_reduction <add>, %66, %cst_30 [1] : vector<2x32xf32> to vector<2xf32>
    %68 = vector.shape_cast %67 : vector<2xf32> to vector<1x2xf32>
    %69 = arith.index_cast %c3_i32 : i32 to index
    %c0_31 = arith.constant 0 : index
    %70 = vector.load %arg8[%69, %c0_31] : memref<8x2xf32, #tpu.memory_space<vmem>>, vector<1x2xf32>
    tpu.vector_store %arg8[%69, %c0_31], %68 {strides = array<i32>} : memref<8x2xf32, #tpu.memory_space<vmem>>, vector<1x2xf32>,
    %c4_i32 = arith.constant 4 : i32
    %71 = arith.index_cast %c4_i32 : i32 to index
    %c0_32 = arith.constant 0 : index
    %c0_33 = arith.constant 0 : index
    %72 = vector.load %arg7[%71, %c0_32, %c0_33] : memref<8x2x32xf32, #tpu.memory_space<vmem>>, vector<1x2x32xf32>
    %73 = vector.shape_cast %72 : vector<1x2x32xf32> to vector<2x32xf32>
    %cst_34 = arith.constant dense<0.000000e+00> : vector<2x32xf32>
    %74 = tpu.matmul %64, %21, %cst_34 {dimension_numbers = #tpu.dot_dimension_numbers<[1], [0], [0], [1], [0, 0, 1, 1], [], []>} : vector<2x32xf32>, vector<32x32xf32>, vector<2x32xf32> -> vector<2x32xf32>
    %75 = arith.addf %73, %74 : vector<2x32xf32>
    %76 = math.tanh %75 : vector<2x32xf32>
    %77 = vector.broadcast %12 : vector<1x32xf32> to vector<2x32xf32>
    %78 = arith.mulf %76, %77 : vector<2x32xf32>
    %cst_35 = arith.constant dense<0.000000e+00> : vector<2xf32>
    %79 = vector.multi_reduction <add>, %78, %cst_35 [1] : vector<2x32xf32> to vector<2xf32>
    %80 = vector.shape_cast %79 : vector<2xf32> to vector<1x2xf32>
    %81 = arith.index_cast %c4_i32 : i32 to index
    %c0_36 = arith.constant 0 : index
    %82 = vector.load %arg8[%81, %c0_36] : memref<8x2xf32, #tpu.memory_space<vmem>>, vector<1x2xf32>
    tpu.vector_store %arg8[%81, %c0_36], %80 {strides = array<i32>} : memref<8x2xf32, #tpu.memory_space<vmem>>, vector<1x2xf32>,
    %c5_i32 = arith.constant 5 : i32
    %83 = arith.index_cast %c5_i32 : i32 to index
    %c0_37 = arith.constant 0 : index
    %c0_38 = arith.constant 0 : index
    %84 = vector.load %arg7[%83, %c0_37, %c0_38] : memref<8x2x32xf32, #tpu.memory_space<vmem>>, vector<1x2x32xf32>
    %85 = vector.shape_cast %84 : vector<1x2x32xf32> to vector<2x32xf32>
    %cst_39 = arith.constant dense<0.000000e+00> : vector<2x32xf32>
    %86 = tpu.matmul %76, %21, %cst_39 {dimension_numbers = #tpu.dot_dimension_numbers<[1], [0], [0], [1], [0, 0, 1, 1], [], []>} : vector<2x32xf32>, vector<32x32xf32>, vector<2x32xf32> -> vector<2x32xf32>
    %87 = arith.addf %85, %86 : vector<2x32xf32>
    %88 = math.tanh %87 : vector<2x32xf32>
    %89 = vector.broadcast %12 : vector<1x32xf32> to vector<2x32xf32>
    %90 = arith.mulf %88, %89 : vector<2x32xf32>
    %cst_40 = arith.constant dense<0.000000e+00> : vector<2xf32>
    %91 = vector.multi_reduction <add>, %90, %cst_40 [1] : vector<2x32xf32> to vector<2xf32>
    %92 = vector.shape_cast %91 : vector<2xf32> to vector<1x2xf32>
    %93 = arith.index_cast %c5_i32 : i32 to index
    %c0_41 = arith.constant 0 : index
    %94 = vector.load %arg8[%93, %c0_41] : memref<8x2xf32, #tpu.memory_space<vmem>>, vector<1x2xf32>
    tpu.vector_store %arg8[%93, %c0_41], %92 {strides = array<i32>} : memref<8x2xf32, #tpu.memory_space<vmem>>, vector<1x2xf32>,
    %c6_i32 = arith.constant 6 : i32
    %95 = arith.index_cast %c6_i32 : i32 to index
    %c0_42 = arith.constant 0 : index
    %c0_43 = arith.constant 0 : index
    %96 = vector.load %arg7[%95, %c0_42, %c0_43] : memref<8x2x32xf32, #tpu.memory_space<vmem>>, vector<1x2x32xf32>
    %97 = vector.shape_cast %96 : vector<1x2x32xf32> to vector<2x32xf32>
    %cst_44 = arith.constant dense<0.000000e+00> : vector<2x32xf32>
    %98 = tpu.matmul %88, %21, %cst_44 {dimension_numbers = #tpu.dot_dimension_numbers<[1], [0], [0], [1], [0, 0, 1, 1], [], []>} : vector<2x32xf32>, vector<32x32xf32>, vector<2x32xf32> -> vector<2x32xf32>
    %99 = arith.addf %97, %98 : vector<2x32xf32>
    %100 = math.tanh %99 : vector<2x32xf32>
    %101 = vector.broadcast %12 : vector<1x32xf32> to vector<2x32xf32>
    %102 = arith.mulf %100, %101 : vector<2x32xf32>
    %cst_45 = arith.constant dense<0.000000e+00> : vector<2xf32>
    %103 = vector.multi_reduction <add>, %102, %cst_45 [1] : vector<2x32xf32> to vector<2xf32>
    %104 = vector.shape_cast %103 : vector<2xf32> to vector<1x2xf32>
    %105 = arith.index_cast %c6_i32 : i32 to index
    %c0_46 = arith.constant 0 : index
    %106 = vector.load %arg8[%105, %c0_46] : memref<8x2xf32, #tpu.memory_space<vmem>>, vector<1x2xf32>
    tpu.vector_store %arg8[%105, %c0_46], %104 {strides = array<i32>} : memref<8x2xf32, #tpu.memory_space<vmem>>, vector<1x2xf32>,
    %c7_i32 = arith.constant 7 : i32
    %107 = arith.index_cast %c7_i32 : i32 to index
    %c0_47 = arith.constant 0 : index
    %c0_48 = arith.constant 0 : index
    %108 = vector.load %arg7[%107, %c0_47, %c0_48] : memref<8x2x32xf32, #tpu.memory_space<vmem>>, vector<1x2x32xf32>
    %109 = vector.shape_cast %108 : vector<1x2x32xf32> to vector<2x32xf32>
    %cst_49 = arith.constant dense<0.000000e+00> : vector<2x32xf32>
    %110 = tpu.matmul %100, %21, %cst_49 {dimension_numbers = #tpu.dot_dimension_numbers<[1], [0], [0], [1], [0, 0, 1, 1], [], []>} : vector<2x32xf32>, vector<32x32xf32>, vector<2x32xf32> -> vector<2x32xf32>
    %111 = arith.addf %109, %110 : vector<2x32xf32>
    %112 = math.tanh %111 : vector<2x32xf32>
    %113 = vector.broadcast %12 : vector<1x32xf32> to vector<2x32xf32>
    %114 = arith.mulf %112, %113 : vector<2x32xf32>
    %cst_50 = arith.constant dense<0.000000e+00> : vector<2xf32>
    %115 = vector.multi_reduction <add>, %114, %cst_50 [1] : vector<2x32xf32> to vector<2xf32>
    %116 = vector.shape_cast %115 : vector<2xf32> to vector<1x2xf32>
    %117 = arith.index_cast %c7_i32 : i32 to index
    %c0_51 = arith.constant 0 : index
    %118 = vector.load %arg8[%117, %c0_51] : memref<8x2xf32, #tpu.memory_space<vmem>>, vector<1x2xf32>
    tpu.vector_store %arg8[%117, %c0_51], %116 {strides = array<i32>} : memref<8x2xf32, #tpu.memory_space<vmem>>, vector<1x2xf32>,
    %c8_i32 = arith.constant 8 : i32
    %c0_52 = arith.constant 0 : index
    %c0_53 = arith.constant 0 : index
    %119 = vector.load %arg6[%c0_52, %c0_53] : memref<2x32xf32, #tpu.memory_space<vmem>>, vector<2x32xf32>
    tpu.vector_store %arg6[%c0_52, %c0_53], %112 {strides = array<i32>} : memref<2x32xf32, #tpu.memory_space<vmem>>, vector<2x32xf32>,
    %c0_54 = arith.constant 0 : index
    %c0_55 = arith.constant 0 : index
    %120 = vector.load %arg8[%c0_54, %c0_55] : memref<8x2xf32, #tpu.memory_space<vmem>>, vector<8x2xf32>
    %121 = tpu.transpose %120, [1, 0] : vector<8x2xf32> -> vector<2x8xf32>
    %122 = vector.broadcast %13 : vector<1x1xf32> to vector<2x8xf32>
    %123 = arith.addf %121, %122 : vector<2x8xf32>
    %c0_56 = arith.constant 0 : index
    %c0_57 = arith.constant 0 : index
    %124 = vector.load %arg5[%c0_56, %c0_57] : memref<2x8xf32, #tpu.memory_space<vmem>>, vector<2x8xf32>
    tpu.vector_store %arg5[%c0_56, %c0_57], %123 {strides = array<i32>} : memref<2x8xf32, #tpu.memory_space<vmem>>, vector<2x8xf32>,
    return
  }
  func.func @transform_0(%arg0: i32) -> (i32, i32, i32) {
    %c0_i32 = arith.constant 0 : i32
    %c0_i32_0 = arith.constant 0 : i32
    %c0_i32_1 = arith.constant 0 : i32
    return %arg0, %c0_i32, %c0_i32_0 : i32, i32, i32
  }
  func.func @transform_1(%arg0: i32) -> (i32, i32) {
    %c0_i32 = arith.constant 0 : i32
    %c0_i32_0 = arith.constant 0 : i32
    %c0_i32_1 = arith.constant 0 : i32
    return %c0_i32, %c0_i32_0 : i32, i32
  }
  func.func @transform_2(%arg0: i32) -> (i32, i32) {
    %c0_i32 = arith.constant 0 : i32
    %c0_i32_0 = arith.constant 0 : i32
    %c0_i32_1 = arith.constant 0 : i32
    return %c0_i32, %c0_i32_0 : i32, i32
  }
  func.func @transform_3(%arg0: i32) -> (i32, i32) {
    %c0_i32 = arith.constant 0 : i32
    %c0_i32_0 = arith.constant 0 : i32
    %c0_i32_1 = arith.constant 0 : i32
    return %c0_i32, %c0_i32_0 : i32, i32
  }
  func.func @transform_4(%arg0: i32) -> (i32, i32) {
    %c0_i32 = arith.constant 0 : i32
    %c0_i32_0 = arith.constant 0 : i32
    return %c0_i32, %arg0 : i32, i32
  }
  func.func @transform_5(%arg0: i32) -> (i32, i32) {
    %c0_i32 = arith.constant 0 : i32
    %c0_i32_0 = arith.constant 0 : i32
    %c0_i32_1 = arith.constant 0 : i32
    return %c0_i32, %c0_i32_0 : i32, i32
  }
}

</mosaic_0001>

<bundles_post_ra>
// kernel: tpu_custom_call.1
= control target key start
LH: loop header
LB: loop body
LE: loop exit
PB: predicated region body
PF: predicated region fallthrough
CT: control target
= control target key end

     0   :  { %11 = vsyncpa [#allocation5], 0  ;;  %s1413_s0 = inlined_call_operand.vmem [shape: f32[8,2,1], index: 0, kind: input, shape index: {}]   ;;  %s1414_s1 = inlined_call_operand.vmem [shape: f32[2,32], index: 1, kind: input, shape index: {}]   ;;  %s1415_s2 = inlined_call_operand.hbm [shape: f32[32,32], index: 2, kind: input, shape index: {}]   ;;  %s1416_s3 = inlined_call_operand.vmem [shape: f32[4,32], index: 3, kind: input, shape index: {}]   ;;  %s1417_s4 = inlined_call_operand.hbm [shape: f32[2,8], index: 4, kind: output, shape index: {0}]   ;;  %s1418_s5 = inlined_call_operand.hbm [shape: f32[2,32], index: 5, kind: output, shape index: {1}]  }
   0x1   :  { %12 = vsyncpa [#allocation6], 0 }
   0x2   :  { %13 = vsyncpa [#allocation9], 0  ;;  %s1196_s18 = smov [#allocation4]   ;;  %s1124_s22 = scalar_lea.hbm %s1415_s2, 512 }
   0x3   :  { %s23_s19 = sshll.u32 %s1196_s18, 4  ;;  %p1125_p0 = scmp.ne.s32.totalorder %s1415_s2, %s1124_s22  ;;  %s24_s19 = int_to_ptr.vmem [resolvable:$true] %s23_s19 }
   0x4   :  { %p1128_p1 = scmp.lt.u32.totalorder %s1124_s22, %s1415_s2 }
   0x6   :  { %p1130_p2 = pnand %p1128_p1, %p1125_p0 }
   0x8   :  { %1133 = shalt.err (!%p1130_p2)
}
   0x9   :  { %s1134_s27 = scalar_lea.vmem %s24_s19, 512  ;;  %p1139_p4 = scmp.lt.s32.totalorder %s24_s19, %s24_s19 }
   0xa   :  { %p1135_p3 = scmp.ne.s32.totalorder %s24_s19, %s1134_s27  ;;  %p1140_p5 = scmp.lt.s32.totalorder %s1134_s27, %s1134_s27 }
   0xc   :  { %p1141_p6 = por %p1140_p5, %p1139_p4 }
   0xe   :  { %p1142_p7 = pnand %p1141_p6, %p1135_p3 }
  0x10   :  { %1145 = shalt.err (!%p1142_p7)
}
  0x11   :  { %s1197_s28 = smov 128   ;;  %s1198_s29 = smov 8  }
  0x12   :  { %29 = dma.hbm_to_vmem [thread:$0]  %s1415_s2, 512, %s24_s19, [#allocation5], %s1197_s28, %s1197_s28, %s1198_s29  }
  0x13   :  { %1190 = dma.done.wait [#allocation5], 512  }
  0x14   :  { %1191 = vsyncadd [#allocation5], 4294966784  ;;  %v1199_v0 = vmov 0.0|0.0   ;;  %vm1200_vm0 = vmmov 0   ;;  %v1201_v1 = vmov 0.0   ;;  %v1202_v2 = vmov 0  }
  0x15   :  { %1047 = vmatprep.subr.bf16.mxu0 %v1199_v0  ;;  %967 = vmatprep.mubr.msk.f32.mxu0 %vm1200_vm0, %v1201_v1  ;;  %vm40_vm1 = vcmask 254976   ;;  %v124_v3 = vld [vmem:[#allocation4] sm:$0xff]  ;;  %v125_v4 = vld [vmem:[#allocation4 + $0x8] sm:$0xff]  ;;  %v126_v5 = vld [vmem:[#allocation4 + $0x10] sm:$0xff]  ;;  %vm130_vm2 = vcmask 261120   ;;  %v91_v15 = vlaneseq  ;;  %vm222_vm3 = vcmask 8192  }
  0x16   :  { %1106 = vset.pattern.permute.xlu0 %v1202_v2  ;;  %1053 = vmatprep.subr.bf16.mxu1 %v1199_v0  ;;  %v1253_v6 = vpack.c.bf16 %v125_v4, %v124_v3  ;;  %v127_v7 = vld [vmem:[#allocation4 + $0x18] sm:$0xff]  ;;  %v39_v8 = vld [vmem:[%s1414_s1] sm:$0x3]  ;;  %v44_v11 = vld [vmem:[%s1413_s0 + $0x2] sm:$0x3] }
  0x17   :  { %978 = vmatprep.mubr.msk.f32.mxu1 %vm1200_vm0, %v1201_v1  ;;  %1107 = vset.pattern.permute.xlu1 %v1202_v2  ;;  %v43_v9 = vld [vmem:[%s1413_s0] sm:$0x3]  ;;  %41 = vst.msk [vmem:[#allocation8] sm:$0x3] %vm40_vm1, %v39_v8  ;;  %v1263_v10 = vpack.c.bf16 %v127_v7, %v126_v5  ;;  %v47_v12 = vld [vmem:[%s1413_s0 + $0x8] sm:$0x3] }
  0x18   :  { %53 = vperm.xlu0 %1106, %v43_v9   ;;  %1049 = vmatpush3.bf16.msra.mxu0 %v1253_v6  ;;  %v49_v14 = vld [vmem:[%s1413_s0 + $0xc] sm:$0x3]  ;;  %v92_v16 = vshrl.u32 %v91_v15, 7  ;;  %v1291_v18 = vld [vmem:[%s1416_s3] sm:$0xf]  ;;  %v216_v47 = vand.u32 127, %v91_v15 }
  0x19   :  { %1055 = vmatpush3.bf16.msra.mxu1 %v1253_v6  ;;  %1050 = vmatprep.subr.bf16.mxu0 %v1199_v0  ;;  %v45_v43 = vld [vmem:[%s1413_s0 + $0x4] sm:$0x3]  ;;  %v46_v44 = vld [vmem:[%s1413_s0 + $0x6] sm:$0x3]  ;;  %v48_v45 = vld [vmem:[%s1413_s0 + $0xa] sm:$0x3] }
  0x1a   :  { %1056 = vmatprep.subr.bf16.mxu1 %v1199_v0  ;;  %v93_v17 = vsub.s32 0, %v92_v16  ;;  %v105_v19 = vsub.s32 1, %v92_v16  ;;  %v208_v38 = vsub.s32 2, %v92_v16  ;;  %63 = vperm.xlu1 %1107, %v45_v43   ;;  %v50_v46 = vld [vmem:[%s1413_s0 + $0xe] sm:$0x3]  ;;  %v1323_v48 = vsub.s32 %v216_v47, %v92_v16  ;;  %s1203_s0 = smov [#allocation8]  }
  0x1b   :  { %s898_s24 = sshll.u32 %s1203_s0, 4  ;;  %s899_s24 = int_to_ptr.vmem [resolvable:$true] %s898_s24 }
  0x1c   :  { %58 = vperm.xlu0 %1106, %v44_v11   ;;  %1052 = vmatpush3.bf16.msra.mxu0 %v1263_v10  ;;  %v94_v20 = vrot.slane %v1291_v18, %v93_v17  ;;  %v106_v21 = vrot.slane %v1291_v18, %v105_v19  ;;  %v1300_v39 = vrot.slane %v1291_v18, %v208_v38  ;;  %s1146_s25 = scalar_lea.vmem %s899_s24, 32  ;;  %p1151_p9 = scmp.lt.s32.totalorder %s899_s24, %s899_s24 }
  0x1d   :  { %1058 = vmatpush3.bf16.msra.mxu1 %v1263_v10  ;;  %1059 = vmatprep.subr.bf16.mxu0 %v1199_v0  ;;  %p1147_p8 = scmp.ne.s32.totalorder %s899_s24, %s1146_s25  ;;  %p1152_p10 = scmp.lt.s32.totalorder %s1146_s25, %s1146_s25 }
  0x1e   :  { %1065 = vmatprep.subr.bf16.mxu1 %v1199_v0  ;;  %v128_v13 = vld [vmem:[#allocation8] sm:$0x3]  ;;  %68 = vperm.xlu1 %1107, %v46_v44  }
  0x1f   :  { %968 = vmatmul.mubr.msk.f32.vlgmr.msra.gmra.mrb[0].mxu0 %vm130_vm2, %v128_v13  ;;  %p1153_p11 = por %p1152_p10, %p1151_p9 }
  0x20   :  { %73 = vperm.xlu0 %1106, %v47_v12   ;;  %1061 = vmatpush3.bf16.msra.mxu0 %v1253_v6 }
  0x21   :  { %989 = vmatprep.mubr.msk.f32.mxu0 %vm1200_vm0, %v1201_v1  ;;  %1062 = vmatprep.subr.bf16.mxu0 %v1199_v0  ;;  %p1154_p12 = pnand %p1153_p11, %p1147_p8 }
  0x22   :  { %78 = vperm.xlu1 %1107, %v48_v45  }
  0x24   :  { %83 = vperm.xlu0 %1106, %v49_v14   ;;  %1064 = vmatpush3.bf16.msra.mxu0 %v1263_v10 }
  0x25   :  { %1071 = vmatprep.subr.bf16.mxu0 %v1199_v0 }
  0x26   :  { %88 = vperm.xlu1 %1107, %v50_v46  }
  0x97   :  { %v54_v22 = vpop.permute.xlu0 %53 }
  0x98   :  { %v95_v23 = vmul.f32 %v94_v20, %v54_v22 }
  0x99   :  { %v64_v51 = vpop.permute.xlu1 %63 }
  0x9a   :  { %v107_v24 = vadd.f32 %v106_v21, %v95_v23  ;;  %v97_v52 = vmul.f32 %v94_v20, %v64_v51 }
  0x9b   :  { %v59_v25 = vpop.permute.xlu0 %58 }
  0x9c   :  { %116 = vst.msk [vmem:[#allocation2] sm:$0x3] %vm40_vm1, %v107_v24  ;;  %v96_v26 = vmul.f32 %v94_v20, %v59_v25  ;;  %v109_v53 = vadd.f32 %v106_v21, %v97_v52 }
  0x9d   :  { %v69_v54 = vpop.permute.xlu1 %68 }
  0x9e   :  { %v108_v27 = vadd.f32 %v106_v21, %v96_v26  ;;  %118 = vst.msk [vmem:[#allocation2 + $0x4] sm:$0x3] %vm40_vm1, %v109_v53  ;;  %v98_v55 = vmul.f32 %v94_v20, %v69_v54 }
  0x9f   :  { %v74_v28 = vpop.permute.xlu0 %73 }
  0xa0   :  { %117 = vst.msk [vmem:[#allocation2 + $0x2] sm:$0x3] %vm40_vm1, %v108_v27  ;;  %v99_v29 = vmul.f32 %v94_v20, %v74_v28  ;;  %v110_v56 = vadd.f32 %v106_v21, %v98_v55 }
  0xa1   :  { %v79_v57 = vpop.permute.xlu1 %78 }
  0xa2   :  { %v111_v30 = vadd.f32 %v106_v21, %v99_v29  ;;  %119 = vst.msk [vmem:[#allocation2 + $0x6] sm:$0x3] %vm40_vm1, %v110_v56  ;;  %v100_v58 = vmul.f32 %v94_v20, %v79_v57 }
  0xa3   :  { %v84_v31 = vpop.permute.xlu0 %83  ;;  %v129_v34 = vld [vmem:[#allocation2] sm:$0x3] }
  0xa4   :  { %120 = vst.msk [vmem:[#allocation2 + $0x8] sm:$0x3] %vm40_vm1, %v111_v30  ;;  %v101_v32 = vmul.f32 %v94_v20, %v84_v31  ;;  %v112_v59 = vadd.f32 %v106_v21, %v100_v58 }
  0xa5   :  { %v89_v60 = vpop.permute.xlu1 %88  ;;  %v313_v12 = vld [vmem:[#allocation2 + $0x4] sm:$0x3] }
  0xa6   :  { %v113_v33 = vadd.f32 %v106_v21, %v101_v32  ;;  %121 = vst.msk [vmem:[#allocation2 + $0xa] sm:$0x3] %vm40_vm1, %v112_v59  ;;  %v102_v61 = vmul.f32 %v94_v20, %v89_v60 }
  0xa7   :  { %v225_v63 = vld [vmem:[#allocation2 + $0x2] sm:$0x3] }
  0xa8   :  { %122 = vst.msk [vmem:[#allocation2 + $0xc] sm:$0x3] %vm40_vm1, %v113_v33  ;;  %v114_v62 = vadd.f32 %v106_v21, %v102_v61 }
  0xa9   :  { %v401_v22 = vld [vmem:[#allocation2 + $0x6] sm:$0x3] }
  0xaa   :  { %123 = vst.msk [vmem:[#allocation2 + $0xe] sm:$0x3] %vm40_vm1, %v114_v62 }
  0xab   :  { %v489_v31 = vld [vmem:[#allocation2 + $0x8] sm:$0x3] }
  0xaf   :  { %v665_v46 = vld [vmem:[#allocation2 + $0xc] sm:$0x3] }
  0xb1   :  { %v753_v56 = vld [vmem:[#allocation2 + $0xe] sm:$0x3] }
  0xf2   :  { %v200_v35 = vpop.f32.mrb[0].mxu0 }
  0xf3   :  { %v204_v36 = vadd.f32 %v200_v35, %v129_v34  ;;  %v969_v37 = vpop.f32.mrb[1].mxu0 }
  0xf5   :  { %1108 = vtanh.f32 %v204_v36 }
  0xff   :  { %v1109_v40 = vpop.eup %1108 }
 0x100   :  { %979 = vmatmul.mubr.msk.f32.vlgmr.msra.gmra.mrb[0].mxu1 %vm130_vm2, %v1109_v40  ;;  %v210_v41 = vmul.f32 %v1109_v40, %v1300_v39 }
 0x101   :  { %1067 = vmatpush3.bf16.msra.mxu1 %v1253_v6  ;;  %1000 = vmatprep.mubr.msk.f32.mxu1 %vm1200_vm0, %v1201_v1 }
 0x102   :  { %v211_v42 = vsel %vm40_vm1, %v210_v41, 0.0  ;;  %1068 = vmatprep.subr.bf16.mxu1 %v1199_v0  ;;  %v577_v41 = vld [vmem:[#allocation2 + $0xa] sm:$0x3] }
 0x103   :  { %212 = vadd.xlane.f32.xlu0 %v211_v42 }
 0x105   :  { %1070 = vmatpush3.bf16.msra.mxu1 %v1263_v10 }
 0x106   :  { %1077 = vmatprep.subr.bf16.mxu1 %v1199_v0 }
 0x190   :  { %v213_v49 = vpop.xlane.xlu0 %212 }
 0x191   :  { %v220_v50 = vrot.slane %v213_v49, %v1323_v48 }
 0x193   :  { %223 = vst.msk [vmem:[#allocation3] sm:$0x1] %vm222_vm3, %v220_v50 }
 0x1d3   :  { %v295_v2 = vpop.f32.mrb[0].mxu1 }
 0x1d4   :  { %v299_v3 = vadd.f32 %v295_v2, %v225_v63  ;;  %v980_v4 = vpop.f32.mrb[1].mxu1  ;;  %v875_v63 = vrot.slane %v1291_v18, 3 }
 0x1d6   :  { %1110 = vtanh.f32 %v299_v3  ;;  %1095 = vpush %v875_v63 }
 0x1e0   :  { %v1111_v5 = vpop.eup %1110 }
 0x1e1   :  { %990 = vmatmul.mubr.msk.f32.vlgmr.msra.gmra.mrb[2].mxu0 %vm130_vm2, %v1111_v5  ;;  %v301_v7 = vmul.f32 %v1111_v5, %v1300_v39 }
 0x1e2   :  { %1073 = vmatpush3.bf16.msra.mxu0 %v1253_v6  ;;  %1011 = vmatprep.mubr.msk.f32.mxu0 %vm1200_vm0, %v1201_v1 }
 0x1e3   :  { %v302_v8 = vsel %vm40_vm1, %v301_v7, 0.0  ;;  %1074 = vmatprep.subr.bf16.mxu0 %v1199_v0 }
 0x1e4   :  { %303 = vadd.xlane.f32.xlu1 %v302_v8 }
 0x1e6   :  { %1076 = vmatpush3.bf16.msra.mxu0 %v1263_v10 }
 0x1e7   :  { %1083 = vmatprep.subr.bf16.mxu0 %v1199_v0 }
 0x271   :  { %v304_v9 = vpop.xlane.xlu1 %303 }
 0x272   :  { %v309_v11 = vrot.slane %v304_v9, %v1323_v48 }
 0x274   :  { %311 = vst.msk [vmem:[#allocation3 + $0x1] sm:$0x1] %vm222_vm3, %v309_v11 }
 0x2b4   :  { %v383_v13 = vpop.f32.mrb[2].mxu0 }
 0x2b5   :  { %v387_v14 = vadd.f32 %v383_v13, %v313_v12  ;;  %v991_v15 = vpop.f32.mrb[3].mxu0 }
 0x2b7   :  { %1112 = vtanh.f32 %v387_v14 }
 0x2c1   :  { %v1113_v16 = vpop.eup %1112 }
 0x2c2   :  { %1001 = vmatmul.mubr.msk.f32.vlgmr.msra.gmra.mrb[2].mxu1 %vm130_vm2, %v1113_v16  ;;  %v389_v17 = vmul.f32 %v1113_v16, %v1300_v39 }
 0x2c3   :  { %1079 = vmatpush3.bf16.msra.mxu1 %v1253_v6  ;;  %1022 = vmatprep.mubr.msk.f32.mxu1 %vm1200_vm0, %v1201_v1 }
 0x2c4   :  { %v390_v19 = vsel %vm40_vm1, %v389_v17, 0.0  ;;  %1080 = vmatprep.subr.bf16.mxu1 %v1199_v0 }
 0x2c5   :  { %391 = vadd.xlane.f32.xlu0 %v390_v19 }
 0x2c7   :  { %1082 = vmatpush3.bf16.msra.mxu1 %v1263_v10 }
 0x2c8   :  { %1089 = vmatprep.subr.bf16.mxu1 %v1199_v0 }
 0x352   :  { %v392_v20 = vpop.xlane.xlu0 %391 }
 0x353   :  { %v397_v21 = vrot.slane %v392_v20, %v1323_v48 }
 0x355   :  { %399 = vst.msk [vmem:[#allocation3 + $0x2] sm:$0x1] %vm222_vm3, %v397_v21 }
 0x395   :  { %v471_v23 = vpop.f32.mrb[2].mxu1 }
 0x396   :  { %v475_v24 = vadd.f32 %v471_v23, %v401_v22  ;;  %v1002_v25 = vpop.f32.mrb[3].mxu1 }
 0x398   :  { %1114 = vtanh.f32 %v475_v24 }
 0x3a2   :  { %v1115_v26 = vpop.eup %1114 }
 0x3a3   :  { %1012 = vmatmul.mubr.msk.f32.vlgmr.msra.gmra.mrb[4].mxu0 %vm130_vm2, %v1115_v26  ;;  %v477_v27 = vmul.f32 %v1115_v26, %v1300_v39 }
 0x3a4   :  { %1085 = vmatpush3.bf16.msra.mxu0 %v1253_v6  ;;  %1033 = vmatprep.mubr.msk.f32.mxu0 %vm1200_vm0, %v1201_v1 }
 0x3a5   :  { %v478_v28 = vsel %vm40_vm1, %v477_v27, 0.0  ;;  %1086 = vmatprep.subr.bf16.mxu0 %v1199_v0 }
 0x3a6   :  { %479 = vadd.xlane.f32.xlu0 %v478_v28 }
 0x3a8   :  { %1088 = vmatpush3.bf16.msra.mxu0 %v1263_v10 }
 0x433   :  { %v480_v29 = vpop.xlane.xlu0 %479 }
 0x434   :  { %v485_v30 = vrot.slane %v480_v29, %v1323_v48 }
 0x436   :  { %487 = vst.msk [vmem:[#allocation3 + $0x3] sm:$0x1] %vm222_vm3, %v485_v30 }
 0x476   :  { %v559_v32 = vpop.f32.mrb[4].mxu0 }
 0x477   :  { %v563_v33 = vadd.f32 %v559_v32, %v489_v31  ;;  %v1013_v34 = vpop.f32.mrb[5].mxu0 }
 0x479   :  { %1116 = vtanh.f32 %v563_v33 }
 0x483   :  { %v1117_v35 = vpop.eup %1116 }
 0x484   :  { %1023 = vmatmul.mubr.msk.f32.vlgmr.msra.gmra.mrb[4].mxu1 %vm130_vm2, %v1117_v35  ;;  %v565_v36 = vmul.f32 %v1117_v35, %v1300_v39 }
 0x485   :  { %1091 = vmatpush3.bf16.msra.mxu1 %v1253_v6  ;;  %1044 = vmatprep.mubr.msk.f32.mxu1 %vm1200_vm0, %v1201_v1 }
 0x486   :  { %v566_v37 = vsel %vm40_vm1, %v565_v36, 0.0  ;;  %1092 = vmatprep.subr.bf16.mxu1 %v1199_v0 }
 0x487   :  { %567 = vadd.xlane.f32.xlu1 %v566_v37 }
 0x489   :  { %1094 = vmatpush3.bf16.msra.mxu1 %v1263_v10 }
 0x514   :  { %v568_v38 = vpop.xlane.xlu1 %567 }
 0x515   :  { %v573_v40 = vrot.slane %v568_v38, %v1323_v48 }
 0x517   :  { %575 = vst.msk [vmem:[#allocation3 + $0x4] sm:$0x1] %vm222_vm3, %v573_v40 }
 0x557   :  { %v647_v42 = vpop.f32.mrb[4].mxu1 }
 0x558   :  { %v651_v43 = vadd.f32 %v647_v42, %v577_v41  ;;  %v1024_v44 = vpop.f32.mrb[5].mxu1 }
 0x55a   :  { %1118 = vtanh.f32 %v651_v43 }
 0x564   :  { %v1119_v6 = vpop.eup %1118 }
 0x565   :  { %1034 = vmatmul.mubr.msk.f32.vlgmr.msra.gmra.mrb[6].mxu0 %vm130_vm2, %v1119_v6  ;;  %v653_v1 = vmul.f32 %v1119_v6, %v1300_v39 }
 0x567   :  { %v654_v0 = vsel %vm40_vm1, %v653_v1, 0.0 }
 0x568   :  { %655 = vadd.xlane.f32.xlu0 %v654_v0 }
 0x5f5   :  { %v656_v45 = vpop.xlane.xlu0 %655 }
 0x5f6   :  { %v661_v10 = vrot.slane %v656_v45, %v1323_v48 }
 0x5f8   :  { %663 = vst.msk [vmem:[#allocation3 + $0x5] sm:$0x1] %vm222_vm3, %v661_v10 }
 0x638   :  { %v735_v47 = vpop.f32.mrb[6].mxu0 }
 0x639   :  { %v739_v49 = vadd.f32 %v735_v47, %v665_v46  ;;  %v1035_v50 = vpop.f32.mrb[7].mxu0 }
 0x63b   :  { %1120 = vtanh.f32 %v739_v49 }
 0x645   :  { %v1121_v51 = vpop.eup %1120 }
 0x646   :  { %1045 = vmatmul.mubr.msk.f32.vlgmr.msra.gmra.mrb[6].mxu1 %vm130_vm2, %v1121_v51  ;;  %v741_v52 = vmul.f32 %v1121_v51, %v1300_v39 }
 0x648   :  { %v742_v53 = vsel %vm40_vm1, %v741_v52, 0.0 }
 0x649   :  { %743 = vadd.xlane.f32.xlu1 %v742_v53 }
 0x6d6   :  { %v744_v54 = vpop.xlane.xlu1 %743 }
 0x6d7   :  { %v749_v55 = vrot.slane %v744_v54, %v1323_v48 }
 0x6d9   :  { %751 = vst.msk [vmem:[#allocation3 + $0x6] sm:$0x1] %vm222_vm3, %v749_v55 }
 0x719   :  { %v823_v57 = vpop.f32.mrb[6].mxu1 }
 0x71a   :  { %v827_v58 = vadd.f32 %v823_v57, %v753_v56  ;;  %v1046_v59 = vpop.f32.mrb[7].mxu1 }
 0x71c   :  { %1122 = vtanh.f32 %v827_v58 }
 0x726   :  { %v1123_v60 = vpop.eup %1122 }
 0x727   :  { %840 = vst.msk [vmem:[#allocation8] sm:$0x3] %vm40_vm1, %v1123_v60  ;;  %v829_v61 = vmul.f32 %v1123_v60, %v1300_v39 }
 0x729   :  { %v830_v62 = vsel %vm40_vm1, %v829_v61, 0.0 }
 0x72a   :  { %831 = vadd.xlane.f32.xlu0 %v830_v62 }
 0x7b7   :  { %v832_v2 = vpop.xlane.xlu0 %831 }
 0x7b8   :  { %v837_v3 = vrot.slane %v832_v2, %v1323_v48 }
 0x7ba   :  { %839 = vst.msk [vmem:[#allocation3 + $0x7] sm:$0x1] %vm222_vm3, %v837_v3 }
 0x7c1   :  { %v841_v4 = vld [vmem:[#allocation3] sm:$0xff] }
 0x7c2   :  { %842 = vxpose.xlu1.b32.start.end [1/1] (short) (narrow) %v841_v4, 8 }
 0x7c3   :  { %1157 = shalt.err (!%p1154_p12)
}
 0x7c4   :  { %s1158_s28 = scalar_lea.hbm %s1418_s5, 32 }
 0x7c5   :  { %p1159_p13 = scmp.ne.s32.totalorder %s1418_s5, %s1158_s28  ;;  %p1162_p0 = scmp.lt.u32.totalorder %s1158_s28, %s1418_s5 }
 0x7c7   :  { %p1164_p1 = pnand %p1162_p0, %p1159_p13 }
 0x7c9   :  { %1167 = shalt.err (!%p1164_p1)
}
 0x7ca   :  { %901 = dma.vmem_to_hbm [thread:$0]  %s899_s24, 32, %s1418_s5, [#allocation9]   ;;  %vm880_vm4 = vcmask 58368  }
 0x7cb   :  { %s1096_s9 = spop %1095  ;;  %s1204_s10 = smov [#allocation7]  }
 0x7cc   :  { %v877_v18 = vstv %s1096_s9  ;;  %s888_s11 = sshll.u32 %s1204_s10, 4  ;;  %s889_s11 = int_to_ptr.vmem [resolvable:$true] %s888_s11 }
 0x7cd   :  { %s1168_s1 = scalar_lea.vmem %s889_s11, 32  ;;  %p1173_p3 = scmp.lt.s32.totalorder %s889_s11, %s889_s11 }
 0x7ce   :  { %p1169_p2 = scmp.ne.s32.totalorder %s889_s11, %s1168_s1  ;;  %p1174_p4 = scmp.lt.s32.totalorder %s1168_s1, %s1168_s1 }
 0x7d0   :  { %p1175_p5 = por %p1174_p4, %p1173_p3 }
 0x7d2   :  { %p1176_p6 = pnand %p1175_p5, %p1169_p2 }
 0x842   :  { %v858_v39 = vpop.trf.xlu1 }
 0x843   :  { %v879_v48 = vadd.f32 %v877_v18, %v858_v39 }
 0x845   :  { %881 = vst.msk [vmem:[#allocation7] sm:$0x3] %vm880_vm4, %v879_v48 }
 0x846   :  { %1179 = shalt.err (!%p1176_p6)
}
 0x847   :  { %s1180_s5 = scalar_lea.hbm %s1417_s4, 32 }
 0x848   :  { %p1181_p7 = scmp.ne.s32.totalorder %s1417_s4, %s1180_s5  ;;  %p1184_p8 = scmp.lt.u32.totalorder %s1180_s5, %s1417_s4 }
 0x84a   :  { %p1186_p9 = pnand %p1184_p8, %p1181_p7 }
 0x84c   :  { %1189 = shalt.err (!%p1186_p9)
}
 0x84d   :  { %891 = dma.vmem_to_hbm [thread:$0]  %s889_s11, 32, %s1417_s4, [#allocation6]  }
 0x84e   :  { %1192 = dma.done.wait [#allocation6], 32  }
 0x84f   :  { %1193 = vsyncadd [#allocation6], 4294967264 }
 0x850   :  { %1194 = dma.done.wait [#allocation9], 32  }
 0x851   :  { %1195 = vsyncadd [#allocation9], 4294967264 }
 0x852   :  { %908 = vsyncpa [#allocation5], 1 }
 0x853   :  { %909 = vsyncpa [#allocation6], 1 }
 0x854   :  { %910 = vsyncpa [#allocation9], 1 }

</bundles_post_ra>
